<compile_context>
chip_gen: v7x
topology: tpu7x:2x2x1
jax: 0.10.0
libtpu: 0.0.40
codegen_flags: <defaults>
</compile_context>

<pallas_src>
import jax
import jax.numpy as jnp
from jax.experimental import pallas as pl
from jax.experimental.pallas import tpu as pltpu

HIDDEN1 = 128
HIDDEN2 = 64
TILE_B_MAX = 2048   # VMEM is nowhere near the limit at these layer sizes.


def _round_up(n, m):
    return ((n + m - 1) // m) * m


def _cdiv(a, b):
    return (a + b - 1) // b


def dqn_kernel(x_ref, w1_ref, b1_ref, w2_ref, b2_ref, w3_ref, b3_ref, o_ref):
    # x_ref:  (tile_b, input_dim)   bf16
    # w*_ref: bf16 weights at natural shapes, resident in VMEM across grid steps
    # b*_ref: (1, H) f32 biases
    # o_ref:  (tile_b, output_dim)  f32
    x = x_ref[...]

    # fc1 + ReLU: bf16 MXU matmul, f32 accumulate, f32 bias/ReLU on the VPU.
    h1 = jnp.dot(x, w1_ref[...], preferred_element_type=jnp.float32) + b1_ref[...]
    h1 = jnp.maximum(h1, 0.0).astype(jnp.bfloat16)

    # fc2 + ReLU (K=128, N=64 — true sizes, no padded lanes).
    h2 = jnp.dot(h1, w2_ref[...], preferred_element_type=jnp.float32) + b2_ref[...]
    h2 = jnp.maximum(h2, 0.0).astype(jnp.bfloat16)

    # fc3 (K=64, N=output_dim), stored f32 directly into the narrow output block.
    out = jnp.dot(h2, w3_ref[...], preferred_element_type=jnp.float32) + b3_ref[...]
    o_ref[...] = out.astype(o_ref.dtype)


def prepare_dqn_params(params):
    """Cast weights to bf16 (f32 accumulation in-kernel), keep biases f32 as (1, H)."""
    w1, b1, w2, b2, w3, b3 = params
    return (
        w1.astype(jnp.bfloat16), b1.reshape(1, -1).astype(jnp.float32),
        w2.astype(jnp.bfloat16), b2.reshape(1, -1).astype(jnp.float32),
        w3.astype(jnp.bfloat16), b3.reshape(1, -1).astype(jnp.float32),
    )


def dqn_forward(x, prepared_params):
    w1, b1, w2, b2, w3, b3 = prepared_params
    batch, input_dim = x.shape
    hidden1 = w1.shape[1]
    hidden2 = w2.shape[1]
    output_dim = w3.shape[1]

    x = x.astype(jnp.bfloat16)

    # Batch tiling: >=2 grid steps once the batch is big enough so both v7x TCs run;
    # tile_b is a multiple of 16 (bf16 sublane packing); padding is at most tile_b-1 rows.
    n_tiles = max(1, _cdiv(batch, TILE_B_MAX))
    if batch >= 512:
        n_tiles = max(n_tiles, 2)
    tile_b = _round_up(_cdiv(batch, n_tiles), 16)
    batch_pad = _round_up(batch, tile_b)
    if batch_pad != batch:
        x = jnp.pad(x, ((0, batch_pad - batch), (0, 0)))
    grid = (batch_pad // tile_b,)

    flops = 2 * batch_pad * (input_dim * hidden1 + hidden1 * hidden2 + hidden2 * output_dim)
    bytes_accessed = (
        x.size * 2
        + (w1.size + w2.size + w3.size) * 2
        + (b1.size + b2.size + b3.size) * 4
        + batch_pad * output_dim * 4
    )

    out = pl.pallas_call(
        dqn_kernel,
        out_shape=jax.ShapeDtypeStruct((batch_pad, output_dim), jnp.float32),
        grid=grid,
        in_specs=[
            pl.BlockSpec((tile_b, input_dim), lambda i: (i, 0)),  # activations: batch-tiled
            pl.BlockSpec(w1.shape, lambda i: (0, 0)),             # weights/biases: resident
            pl.BlockSpec(b1.shape, lambda i: (0, 0)),
            pl.BlockSpec(w2.shape, lambda i: (0, 0)),
            pl.BlockSpec(b2.shape, lambda i: (0, 0)),
            pl.BlockSpec(w3.shape, lambda i: (0, 0)),
            pl.BlockSpec(b3.shape, lambda i: (0, 0)),
        ],
        out_specs=pl.BlockSpec((tile_b, output_dim), lambda i: (i, 0)),  # narrow output
        compiler_params=pltpu.CompilerParams(
            dimension_semantics=("parallel",)),                   # shard batch over TCs (v7x)
        cost_estimate=pl.CostEstimate(
            flops=flops, transcendentals=0, bytes_accessed=bytes_accessed),
    )(x, w1, b1, w2, b2, w3, b3)

    if batch_pad != batch:
        out = out[:batch]
    return out


def init_dqn_params(key, input_dim, output_dim):
    """Deterministic init mimicking PyTorch nn.Linear default (uniform +/- 1/sqrt(fan_in))."""
    def linear_init(k, fan_in, fan_out):
        kw, kb = jax.random.split(k)
        bound = 1.0 / jnp.sqrt(jnp.float32(fan_in))
        w = jax.random.uniform(kw, (fan_in, fan_out), jnp.float32, -bound, bound)
        b = jax.random.uniform(kb, (1, fan_out), jnp.float32, -bound, bound)
        return w, b

    k1, k2, k3 = jax.random.split(key, 3)
    w1, b1 = linear_init(k1, input_dim, HIDDEN1)
    w2, b2 = linear_init(k2, HIDDEN1, HIDDEN2)
    w3, b3 = linear_init(k3, HIDDEN2, output_dim)
    return (w1, b1, w2, b2, w3, b3)


def _reference(x, params):
    w1, b1, w2, b2, w3, b3 = params
    h = jnp.maximum(x @ w1 + b1, 0.0)
    h = jnp.maximum(h @ w2 + b2, 0.0)
    return h @ w3 + b3


if __name__ == "__main__":
    key = jax.random.PRNGKey(0)
    kx, kx2, kp = jax.random.split(key, 3)

    input_dim, output_dim = 32, 4
    params = init_dqn_params(kp, input_dim, output_dim)
    prepared = prepare_dqn_params(params)

    # Small action-selection batch (single grid step).
    batch = 8
    x = jax.random.normal(kx, (batch, input_dim), jnp.float32)
    out = jax.block_until_ready(dqn_forward(x, prepared))
    ref = _reference(x, params)
    assert out.shape == (batch, output_dim)
    assert jnp.allclose(out, ref, atol=5e-2, rtol=5e-2), float(jnp.max(jnp.abs(out - ref)))

    # Larger replay-buffer batch: exercises the >=2-grid-step path (v7x 2-TC sharding)
    # and the minimal batch padding.
    batch2 = 600
    x2 = jax.random.normal(kx2, (batch2, input_dim), jnp.float32)
    out2 = jax.block_until_ready(dqn_forward(x2, prepared))
    ref2 = _reference(x2, params)
    assert out2.shape == (batch2, output_dim)
    assert jnp.allclose(out2, ref2, atol=5e-2, rtol=5e-2), float(jnp.max(jnp.abs(out2 - ref2)))

    print("KERNEL_OK")
</pallas_src>

<mosaic_0001>
module attributes {stable_mosaic.version = 11 : i64} {
  func.func @dqn_kernel(%arg0: i32, %arg1: memref<16x32xbf16, #tpu.memory_space<vmem>>, %arg2: memref<32x128xbf16, #tpu.memory_space<vmem>>, %arg3: memref<1x128xf32, #tpu.memory_space<vmem>>, %arg4: memref<128x64xbf16, #tpu.memory_space<vmem>>, %arg5: memref<1x64xf32, #tpu.memory_space<vmem>>, %arg6: memref<64x4xbf16, #tpu.memory_space<vmem>>, %arg7: memref<1x4xf32, #tpu.memory_space<vmem>>, %arg8: memref<16x4xf32, #tpu.memory_space<vmem>>) attributes {dimension_semantics = [#tpu.dimension_semantics<parallel>], iteration_bounds = array<i64: 1>, scalar_prefetch = 0 : i64, scratch_operands = 0 : i64, tpu.core_type = #tpu.core_type<tc>, window_params = [{transform_indices = @transform_0, window_bounds = array<i64: 16, 32>}, {pipeline_mode = #tpu.pipeline_mode<synchronous>, transform_indices = @transform_1, window_bounds = array<i64: 32, 128>}, {pipeline_mode = #tpu.pipeline_mode<synchronous>, transform_indices = @transform_2, window_bounds = array<i64: 1, 128>}, {pipeline_mode = #tpu.pipeline_mode<synchronous>, transform_indices = @transform_3, window_bounds = array<i64: 128, 64>}, {pipeline_mode = #tpu.pipeline_mode<synchronous>, transform_indices = @transform_4, window_bounds = array<i64: 1, 64>}, {pipeline_mode = #tpu.pipeline_mode<synchronous>, transform_indices = @transform_5, window_bounds = array<i64: 64, 4>}, {pipeline_mode = #tpu.pipeline_mode<synchronous>, transform_indices = @transform_6, window_bounds = array<i64: 1, 4>}, {transform_indices = @transform_7, window_bounds = array<i64: 16, 4>}]} {
    %c0 = arith.constant 0 : index
    %c0_0 = arith.constant 0 : index
    %0 = vector.load %arg1[%c0, %c0_0] : memref<16x32xbf16, #tpu.memory_space<vmem>>, vector<16x32xbf16>
    %c0_1 = arith.constant 0 : index
    %c0_2 = arith.constant 0 : index
    %1 = vector.load %arg2[%c0_1, %c0_2] : memref<32x128xbf16, #tpu.memory_space<vmem>>, vector<32x128xbf16>
    %cst = arith.constant dense<0.000000e+00> : vector<16x128xf32>
    %2 = tpu.matmul %0, %1, %cst {dimension_numbers = #tpu.dot_dimension_numbers<[1], [0], [0], [1], [0, 0, 1, 1], [], []>} : vector<16x32xbf16>, vector<32x128xbf16>, vector<16x128xf32> -> vector<16x128xf32>
    %c0_3 = arith.constant 0 : index
    %c0_4 = arith.constant 0 : index
    %3 = vector.load %arg3[%c0_3, %c0_4] : memref<1x128xf32, #tpu.memory_space<vmem>>, vector<1x128xf32>
    %4 = vector.broadcast %3 : vector<1x128xf32> to vector<16x128xf32>
    %5 = arith.addf %2, %4 : vector<16x128xf32>
    %cst_5 = arith.constant 0.000000e+00 : f32
    %6 = vector.broadcast %cst_5 : f32 to vector<16x128xf32>
    %7 = arith.maximumf %5, %6 : vector<16x128xf32>
    %8 = arith.truncf %7 : vector<16x128xf32> to vector<16x128xbf16>
    %c0_6 = arith.constant 0 : index
    %c0_7 = arith.constant 0 : index
    %9 = vector.load %arg4[%c0_6, %c0_7] : memref<128x64xbf16, #tpu.memory_space<vmem>>, vector<128x64xbf16>
    %cst_8 = arith.constant dense<0.000000e+00> : vector<16x64xf32>
    %10 = tpu.matmul %8, %9, %cst_8 {dimension_numbers = #tpu.dot_dimension_numbers<[1], [0], [0], [1], [0, 0, 1, 1], [], []>} : vector<16x128xbf16>, vector<128x64xbf16>, vector<16x64xf32> -> vector<16x64xf32>
    %c0_9 = arith.constant 0 : index
    %c0_10 = arith.constant 0 : index
    %11 = vector.load %arg5[%c0_9, %c0_10] : memref<1x64xf32, #tpu.memory_space<vmem>>, vector<1x64xf32>
    %12 = vector.broadcast %11 : vector<1x64xf32> to vector<16x64xf32>
    %13 = arith.addf %10, %12 : vector<16x64xf32>
    %cst_11 = arith.constant 0.000000e+00 : f32
    %14 = vector.broadcast %cst_11 : f32 to vector<16x64xf32>
    %15 = arith.maximumf %13, %14 : vector<16x64xf32>
    %16 = arith.truncf %15 : vector<16x64xf32> to vector<16x64xbf16>
    %c0_12 = arith.constant 0 : index
    %c0_13 = arith.constant 0 : index
    %17 = vector.load %arg6[%c0_12, %c0_13] : memref<64x4xbf16, #tpu.memory_space<vmem>>, vector<64x4xbf16>
    %cst_14 = arith.constant dense<0.000000e+00> : vector<16x4xf32>
    %18 = tpu.matmul %16, %17, %cst_14 {dimension_numbers = #tpu.dot_dimension_numbers<[1], [0], [0], [1], [0, 0, 1, 1], [], []>} : vector<16x64xbf16>, vector<64x4xbf16>, vector<16x4xf32> -> vector<16x4xf32>
    %c0_15 = arith.constant 0 : index
    %c0_16 = arith.constant 0 : index
    %19 = vector.load %arg7[%c0_15, %c0_16] : memref<1x4xf32, #tpu.memory_space<vmem>>, vector<1x4xf32>
    %20 = vector.broadcast %19 : vector<1x4xf32> to vector<16x4xf32>
    %21 = arith.addf %18, %20 : vector<16x4xf32>
    %c0_17 = arith.constant 0 : index
    %c0_18 = arith.constant 0 : index
    %22 = vector.load %arg8[%c0_17, %c0_18] : memref<16x4xf32, #tpu.memory_space<vmem>>, vector<16x4xf32>
    tpu.vector_store %arg8[%c0_17, %c0_18], %21 {strides = array<i32>} : memref<16x4xf32, #tpu.memory_space<vmem>>, vector<16x4xf32>,
    return
  }
  func.func @transform_0(%arg0: i32) -> (i32, i32) {
    %c0_i32 = arith.constant 0 : i32
    %c0_i32_0 = arith.constant 0 : i32
    return %arg0, %c0_i32 : i32, i32
  }
  func.func @transform_1(%arg0: i32) -> (i32, i32) {
    %c0_i32 = arith.constant 0 : i32
    %c0_i32_0 = arith.constant 0 : i32
    %c0_i32_1 = arith.constant 0 : i32
    return %c0_i32, %c0_i32_0 : i32, i32
  }
  func.func @transform_2(%arg0: i32) -> (i32, i32) {
    %c0_i32 = arith.constant 0 : i32
    %c0_i32_0 = arith.constant 0 : i32
    %c0_i32_1 = arith.constant 0 : i32
    return %c0_i32, %c0_i32_0 : i32, i32
  }
  func.func @transform_3(%arg0: i32) -> (i32, i32) {
    %c0_i32 = arith.constant 0 : i32
    %c0_i32_0 = arith.constant 0 : i32
    %c0_i32_1 = arith.constant 0 : i32
    return %c0_i32, %c0_i32_0 : i32, i32
  }
  func.func @transform_4(%arg0: i32) -> (i32, i32) {
    %c0_i32 = arith.constant 0 : i32
    %c0_i32_0 = arith.constant 0 : i32
    %c0_i32_1 = arith.constant 0 : i32
    return %c0_i32, %c0_i32_0 : i32, i32
  }
  func.func @transform_5(%arg0: i32) -> (i32, i32) {
    %c0_i32 = arith.constant 0 : i32
    %c0_i32_0 = arith.constant 0 : i32
    %c0_i32_1 = arith.constant 0 : i32
    return %c0_i32, %c0_i32_0 : i32, i32
  }
  func.func @transform_6(%arg0: i32) -> (i32, i32) {
    %c0_i32 = arith.constant 0 : i32
    %c0_i32_0 = arith.constant 0 : i32
    %c0_i32_1 = arith.constant 0 : i32
    return %c0_i32, %c0_i32_0 : i32, i32
  }
  func.func @transform_7(%arg0: i32) -> (i32, i32) {
    %c0_i32 = arith.constant 0 : i32
    %c0_i32_0 = arith.constant 0 : i32
    return %arg0, %c0_i32 : i32, i32
  }
}

</mosaic_0001>

<bundles_post_ra>
// kernel: tpu_custom_call.1
= control target key start
LH: loop header
LB: loop body
LE: loop exit
PB: predicated region body
PF: predicated region fallthrough
CT: control target
= control target key end

     0   :  { %v405_v0 = vmov 0.0   ;;  %vm406_vm0 = vmmov 0   ;;  %vm57_vm1 = vcmask 261120   ;;  %vm259_vm2 = vcmask 523264   ;;  %s510_s1 = inlined_call_operand.vmem [shape: bf16[32,128], index: 1, kind: input, shape index: {}]   ;;  %s511_s3 = inlined_call_operand.vmem [shape: bf16[128,64], index: 3, kind: input, shape index: {}]   ;;  %s512_s0 = inlined_call_operand.vmem [shape: bf16[16,32], index: 0, kind: input, shape index: {}]   ;;  %s513_s5 = inlined_call_operand.vmem [shape: bf16[64,4], index: 5, kind: input, shape index: {}]   ;;  %s514_s2 = inlined_call_operand.vmem [shape: f32[1,128], index: 2, kind: input, shape index: {}]   ;;  %s515_s4 = inlined_call_operand.vmem [shape: f32[1,64], index: 4, kind: input, shape index: {}]   ;;  %s516_s6 = inlined_call_operand.vmem [shape: f32[1,4], index: 6, kind: input, shape index: {}]   ;;  %s517_s7 = inlined_call_operand.vmem [shape: f32[16,4], index: 7, kind: output, shape index: {}]  }
   0x1   :  { %348 = vmatprep.subr.bf16.mxu0 %v405_v0  ;;  %v390_v1 = vld [vmem:[%s510_s1] sm:$0xff]   ;;  %352 = vmatprep.mubr.msk.bf16.mxu0 %vm406_vm0, %v405_v0  ;;  %v391_v2 = vld [vmem:[%s510_s1 + $0x8] sm:$0xff]   ;;  %v395_v6 = vld [vmem:[%s511_s3 + $0x10] sm:$0xff]   ;;  %vm304_vm3 = vcmask 31744  }
   0x2   :  { %356 = vmatprep.subr.bf16.mxu1 %v405_v0  ;;  %372 = vmatprep.mubr.msk.bf16.mxu1 %vm406_vm0, %v405_v0  ;;  %v393_v3 = vld [vmem:[%s511_s3] sm:$0xff]   ;;  %v394_v5 = vld [vmem:[%s511_s3 + $0x8] sm:$0xff]   ;;  %v396_v7 = vld [vmem:[%s511_s3 + $0x18] sm:$0xff]  }
   0x3   :  { %349 = vmatpush3.bf16.msra.mxu0 %v390_v1  ;;  %v392_v4 = vld [vmem:[%s512_s0] sm:$0xff]   ;;  %357 = vmatpush3.bf16.msra.mxu1 %v393_v3  ;;  %v398_v9 = vld [vmem:[%s511_s3 + $0x28] sm:$0xff]   ;;  %v399_v10 = vld [vmem:[%s511_s3 + $0x30] sm:$0xff]  }
   0x4   :  { %350 = vmatprep.subr.bf16.mxu0 %v405_v0  ;;  %358 = vmatprep.subr.bf16.mxu1 %v405_v0  ;;  %v397_v8 = vld [vmem:[%s511_s3 + $0x20] sm:$0xff]   ;;  %v400_v11 = vld [vmem:[%s511_s3 + $0x38] sm:$0xff]   ;;  %v402_v13 = vld [vmem:[%s513_s5 + $0x8] sm:$0xff]  }
   0x5   :  { %v401_v12 = vld [vmem:[%s513_s5] sm:$0xff]   ;;  %v403_v24 = vld [vmem:[%s513_s5 + $0x10] sm:$0xff]   ;;  %v404_v25 = vld [vmem:[%s513_s5 + $0x18] sm:$0xff]  }
   0x6   :  { %v311_v14 = vld [vmem:[%s514_s2] ss:$0 sm:$0xff] }
   0x7   :  { %351 = vmatpush3.bf16.msra.mxu0 %v391_v2  ;;  %359 = vmatpush3.bf16.msra.mxu1 %v394_v5  ;;  %v316_v26 = vld [vmem:[%s515_s4] ss:$0 sm:$0xff] }
   0x8   :  { %376 = vmatprep.subr.bf16.mxu0 %v405_v0  ;;  %360 = vmatprep.subr.bf16.mxu1 %v405_v0  ;;  %v325_v36 = vld [vmem:[%s516_s6] ss:$0 sm:$0xff] }
   0xa   :  { %353 = vmatmul.mubr.msk.bf16.vlgmr.msra.gmra.mrb[0].mxu0 %vm57_vm1, %v392_v4 }
   0xb   :  { %384 = vmatprep.mubr.msk.bf16.mxu0 %vm406_vm0, %v405_v0  ;;  %361 = vmatpush3.bf16.msra.mxu1 %v395_v6 }
   0xc   :  { %362 = vmatprep.subr.bf16.mxu1 %v405_v0  ;;  %377 = vmatpush3.bf16.msra.mxu0 %v401_v12 }
   0xd   :  { %378 = vmatprep.subr.bf16.mxu0 %v405_v0 }
   0xf   :  { %363 = vmatpush3.bf16.msra.mxu1 %v396_v7 }
  0x10   :  { %364 = vmatprep.subr.bf16.mxu1 %v405_v0  ;;  %379 = vmatpush3.bf16.msra.mxu0 %v402_v13 }
  0x11   :  { %380 = vmatprep.subr.bf16.mxu0 %v405_v0 }
  0x13   :  { %365 = vmatpush3.bf16.msra.mxu1 %v397_v8 }
  0x14   :  { %366 = vmatprep.subr.bf16.mxu1 %v405_v0  ;;  %381 = vmatpush3.bf16.msra.mxu0 %v403_v24 }
  0x15   :  { %382 = vmatprep.subr.bf16.mxu0 %v405_v0 }
  0x17   :  { %367 = vmatpush3.bf16.msra.mxu1 %v398_v9 }
  0x18   :  { %368 = vmatprep.subr.bf16.mxu1 %v405_v0  ;;  %383 = vmatpush3.bf16.msra.mxu0 %v404_v25 }
  0x1b   :  { %369 = vmatpush3.bf16.msra.mxu1 %v399_v10 }
  0x1c   :  { %370 = vmatprep.subr.bf16.mxu1 %v405_v0 }
  0x1f   :  { %371 = vmatpush3.bf16.msra.mxu1 %v400_v11 }
  0xdd   :  { %v95_v15 = vpop.f32.mrb[0].mxu0 }
  0xde   :  { %v96_v16 = vadd.f32 %v311_v14, %v95_v15  ;;  %v354_v17 = vpop.f32.mrb[1].mxu0 }
  0xdf   :  { %v98_v18 = vpop.f32.mrb[2].mxu0 }
  0xe0   :  { %v99_v19 = vadd.f32 %v311_v14, %v98_v18  ;;  %v355_v20 = vpop.f32.mrb[3].mxu0  ;;  %v102_v21 = vmax.f32 %v96_v16, 0.0 }
  0xe2   :  { %v103_v22 = vmax.f32 %v99_v19, 0.0 }
  0xe4   :  { %v104_v23 = vpack.c.bf16 %v103_v22, %v102_v21 }
  0xe6   :  { %373 = vmatmul.mubr.bf16.vlgmr.msra.gmra.mrb[0].mxu1 %v104_v23 }
 0x1b9   :  { %v210_v27 = vpop.f32.mrb[0].mxu1 }
 0x1ba   :  { %v211_v28 = vadd.f32 %v316_v26, %v210_v27  ;;  %v374_v29 = vpop.f32.mrb[1].mxu1 }
 0x1bb   :  { %v213_v30 = vpop.f32.mrb[2].mxu1 }
 0x1bc   :  { %v214_v31 = vadd.f32 %v316_v26, %v213_v30  ;;  %v375_v32 = vpop.f32.mrb[3].mxu1  ;;  %v217_v33 = vmax.f32 %v211_v28, 0.0 }
 0x1be   :  { %v218_v34 = vmax.f32 %v214_v31, 0.0 }
 0x1c0   :  { %v219_v35 = vpack.c.bf16 %v218_v34, %v217_v33 }
 0x1c2   :  { %385 = vmatmul.mubr.msk.bf16.vlgmr.msra.gmra.mrb[4].mxu0 %vm259_vm2, %v219_v35 }
 0x295   :  { %v297_v37 = vpop.f32.mrb[4].mxu0 }
 0x296   :  { %v298_v38 = vadd.f32 %v325_v36, %v297_v37  ;;  %v386_v39 = vpop.f32.mrb[5].mxu0 }
 0x297   :  { %v300_v40 = vpop.f32.mrb[6].mxu0 }
 0x298   :  { %305 = vst.msk [vmem:[%s517_s7] sm:$0xff] %vm304_vm3, %v298_v38  ;;  %v301_v41 = vadd.f32 %v325_v36, %v300_v40  ;;  %v387_v42 = vpop.f32.mrb[7].mxu0 }
 0x29a   :  { %306 = vst.msk [vmem:[%s517_s7 + $0x8] sm:$0xff] %vm304_vm3, %v301_v41 }

</bundles_post_ra>
